<compile_context>
chip_gen: v5e
topology: v5e:2x2
jax: 0.10.0
libtpu: 0.0.40
codegen_flags: <defaults>
</compile_context>

<pallas_src>
import functools

import jax
import jax.numpy as jnp
from jax import lax
from jax.experimental import pallas as pl
from jax.experimental.pallas import tpu as pltpu


# ---------------------------------------------------------------------------
# Pass 1: k[b] = s2m[b]^T @ c[b]  (q2c attention, reassociated), (B, q_len, H)
# ---------------------------------------------------------------------------
def _k_kernel(c_ref, qe_ref, cm_ref, k_ref, m_sc, l_sc, k_acc):
    t = pl.program_id(1)

    @pl.when(t == 0)
    def _():
        m_sc[...] = jnp.full(m_sc.shape, -jnp.inf, jnp.float32)
        l_sc[...] = jnp.zeros(l_sc.shape, jnp.float32)
        k_acc[...] = jnp.zeros(k_acc.shape, jnp.float32)

    dd = c_ref.dtype                        # MXU input dtype (bf16 or f32)
    c_t = c_ref[0]                          # (Tc, H)
    q_eff = qe_ref[0]                       # (Q, H) = q*cq_w + c_w (hoisted)
    cm = cm_ref[0]                          # (1, Tc) float mask, lane-dense

    # st[j, i] = c[i]·(q[j]*cq_w + c_w); the q·q_w and bias terms are constant
    # along the context axis and cancel in this softmax.
    st = lax.dot_general(q_eff, c_t, (((1,), (1,)), ((), ())),
                         preferred_element_type=jnp.float32)      # (Q, Tc)
    st = jnp.where(cm > 0, st, -1e30)

    m_prev = m_sc[...]
    m_new = jnp.maximum(m_prev, jnp.max(st, axis=-1, keepdims=True))
    alpha = jnp.exp(m_prev - m_new)
    p = jnp.exp(st - m_new)                                       # (Q, Tc)
    l_sc[...] = alpha * l_sc[...] + jnp.sum(p, axis=-1, keepdims=True)
    k_acc[...] = alpha * k_acc[...] + jnp.dot(
        p.astype(dd), c_t, preferred_element_type=jnp.float32)    # (Q, H)
    m_sc[...] = m_new

    @pl.when(t == pl.num_programs(1) - 1)
    def _():
        # Exact reciprocal: k feeds a second matmul (b = s1m @ k), so an
        # approx-recip error would propagate into c*b.
        k_ref[0] = (k_acc[...] / l_sc[...]).astype(k_ref.dtype)


# ---------------------------------------------------------------------------
# Pass 2: per context tile -> out = [c, a, c*a, c*b], a/b via one fused matmul
# ---------------------------------------------------------------------------
def _out_kernel(c_ref, qs_ref, qk_ref, s1m_ref, out_ref):
    dd = c_ref.dtype
    c_t = c_ref[0]                          # (Tc, H)
    qs = qs_ref[0]                          # (Q, H)  = q*cq_w         (hoisted)
    qk = qk_ref[0]                          # (Q, 2H) = [q | k]        (hoisted)
    s1m = s1m_ref[0]                        # (1, Q)  masked q·q_w row (hoisted)

    # Softmax over the query axis.  s0 = c·c_w and the bias are constant along
    # this axis and cancel; remaining terms are s2 + s1 (mask folded into s1m).
    logits = lax.dot_general(c_t, qs, (((1,), (1,)), ((), ())),
                             preferred_element_type=jnp.float32)  # (Tc, Q)
    logits = logits + s1m
    m = jnp.max(logits, axis=-1, keepdims=True)
    p = jnp.exp(logits - m)
    l = jnp.sum(p, axis=-1, keepdims=True)
    p1 = p * pl.reciprocal(l, approx=True)                        # (Tc, Q)

    ab = jnp.dot(p1.astype(dd), qk,
                 preferred_element_type=jnp.float32)              # (Tc, 2H)

    H = c_t.shape[1]
    c_f32 = c_t.astype(jnp.float32)
    a = ab[:, :H]
    b = ab[:, H:]
    od = out_ref.dtype
    out_ref[0, :, 0:H] = c_f32.astype(od)
    out_ref[0, :, H:2 * H] = a.astype(od)
    out_ref[0, :, 2 * H:3 * H] = (c_f32 * a).astype(od)
    out_ref[0, :, 3 * H:4 * H] = (c_f32 * b).astype(od)


def _round_up(x, m):
    return (x + m - 1) // m * m


def _choose_tile_c(c_len, cap=1024):
    """Pick (tile_c, c_len_padded, num_tiles); prefer nt == 1 and no padding."""
    if c_len <= cap:
        return c_len, c_len, 1
    for tile in range(cap - cap % 128, 127, -128):   # exact divisors first
        if c_len % tile == 0:
            return tile, c_len, c_len // tile
    nt = (c_len + cap - 1) // cap
    tile = _round_up((c_len + nt - 1) // nt, 128)
    return tile, nt * tile, nt


@functools.partial(jax.jit, static_argnames=("tile_c", "out_dtype"))
def bidaf_attention(c, q, c_mask, q_mask, c_weight, q_weight, cq_weight, bias,
                    *, tile_c=None, out_dtype=None):
    """out = concat([c, a, c*a, c*b], -1), eval-mode BiDAFAttention.forward."""
    del bias  # constant over both masked softmaxes -> cancels exactly.

    B, c_len, H = c.shape
    q_len = q.shape[1]
    dd = c.dtype
    if out_dtype is None:
        out_dtype = dd          # bf16 in -> bf16 out: halves HBM writeback
    q = q.astype(dd)

    # Context tiling: large tiles so per-grid-step overhead is amortized and,
    # for typical c_len, nt == 1 (no pad, no output slice, no online-softmax).
    if tile_c is None:
        tile_c, c_len_p, nt = _choose_tile_c(c_len)
    else:
        tile_c = min(tile_c, c_len)
        nt = (c_len + tile_c - 1) // tile_c
        c_len_p = nt * tile_c
        if nt > 1 and tile_c % 128 != 0:
            raise ValueError("tile_c must be a multiple of 128 when it tiles c_len")
    q_len_p = _round_up(q_len, 8)

    cm = c_mask.astype(jnp.float32).reshape(B, c_len)
    qm = q_mask.astype(jnp.float32).reshape(B, q_len)
    if c_len_p != c_len:        # fallback only; _choose_tile_c avoids this
        pad = c_len_p - c_len
        c = jnp.pad(c, ((0, 0), (0, pad), (0, 0)))
        cm = jnp.pad(cm, ((0, 0), (0, pad)))
    if q_len_p != q_len:
        pad = q_len_p - q_len
        q = jnp.pad(q, ((0, 0), (0, pad), (0, 0)))
        qm = jnp.pad(qm, ((0, 0), (0, pad)))
    cm = cm.reshape(B, 1, c_len_p)              # lane-dense context mask
    qm = qm.reshape(B, 1, q_len_p)

    cw = c_weight.reshape(1, 1, H).astype(jnp.float32)
    qw = q_weight.reshape(H, 1).astype(jnp.float32)
    cqw = cq_weight.reshape(1, 1, H).astype(jnp.float32)

    # Hoisted q-side precompute: tiny O(B*q_len*H) XLA ops done once per call
    # instead of per context tile inside the kernels.
    q_f32 = q.astype(jnp.float32)
    q_eff = (q_f32 * cqw + cw).astype(dd)               # pass-1 logits RHS
    q_scaled = (q_f32 * cqw).astype(dd)                 # pass-2 s2 RHS
    s1_row = jnp.swapaxes(jnp.matmul(q_f32, qw), 1, 2)  # (B, 1, Qp)
    s1_masked = jnp.where(qm > 0, s1_row, -1e30).astype(jnp.float32)

    # ---- pass 1: k = s2m^T @ c ---------------------------------------------
    k = pl.pallas_call(
        _k_kernel,
        out_shape=jax.ShapeDtypeStruct((B, q_len_p, H), dd),
        grid_spec=pltpu.PrefetchScalarGridSpec(
            num_scalar_prefetch=0,
            grid=(B, nt),
            in_specs=[
                pl.BlockSpec((1, tile_c, H), lambda b, t: (b, t, 0)),
                pl.BlockSpec((1, q_len_p, H), lambda b, t: (b, 0, 0)),
                pl.BlockSpec((1, 1, tile_c), lambda b, t: (b, 0, t)),
            ],
            out_specs=pl.BlockSpec((1, q_len_p, H), lambda b, t: (b, 0, 0)),
            scratch_shapes=[
                pltpu.VMEM((q_len_p, 1), jnp.float32),   # running max
                pltpu.VMEM((q_len_p, 1), jnp.float32),   # running denom
                pltpu.VMEM((q_len_p, H), jnp.float32),   # k accumulator
            ]),
        compiler_params=pltpu.CompilerParams(
            dimension_semantics=("parallel", "arbitrary")),
    )(c, q_eff, cm)

    qk = jnp.concatenate([q, k], axis=-1)               # (B, Qp, 2H), tiny

    # Pass-2 VMEM working set (double-buffered); set the scoped limit only if
    # it would exceed the ~32 MiB default (v7x has 64 MiB physical).
    isz = jnp.dtype(dd).itemsize
    osz = jnp.dtype(out_dtype).itemsize
    est = 2 * (tile_c * H * isz + 3 * q_len_p * H * isz + 4 * q_len_p
               + tile_c * 4 * H * osz)
    cp = {"dimension_semantics": ("parallel", "parallel")}
    if est > (28 << 20):
        cp["vmem_limit_bytes"] = int(min(2 * est, 64 << 20))

    # ---- pass 2: [c, a, c*a, c*b] per context tile ---------------------------
    out = pl.pallas_call(
        _out_kernel,
        out_shape=jax.ShapeDtypeStruct((B, c_len_p, 4 * H), out_dtype),
        grid_spec=pltpu.PrefetchScalarGridSpec(
            num_scalar_prefetch=0,
            grid=(B, nt),
            in_specs=[
                pl.BlockSpec((1, tile_c, H), lambda b, t: (b, t, 0)),
                pl.BlockSpec((1, q_len_p, H), lambda b, t: (b, 0, 0)),
                pl.BlockSpec((1, q_len_p, 2 * H), lambda b, t: (b, 0, 0)),
                pl.BlockSpec((1, 1, q_len_p), lambda b, t: (b, 0, 0)),
            ],
            out_specs=pl.BlockSpec((1, tile_c, 4 * H), lambda b, t: (b, t, 0)),
        ),
        compiler_params=pltpu.CompilerParams(**cp),
    )(c, q_scaled, qk, s1_masked)

    if c_len_p != c_len:        # fallback only (extra copy); avoided above
        out = out[:, :c_len, :]
    return out


def _reference(c, q, c_mask, q_mask, c_weight, q_weight, cq_weight, bias):
    """Plain-JAX replica of the PyTorch forward (eval mode, no dropout)."""
    B, c_len, H = c.shape
    q_len = q.shape[1]
    s0 = jnp.matmul(c, c_weight)                                   # (B, c_len, 1)
    s1 = jnp.swapaxes(jnp.matmul(q, q_weight), 1, 2)               # (B, 1, q_len)
    s2 = jnp.matmul(c * cq_weight, jnp.swapaxes(q, 1, 2))          # (B, c_len, q_len)
    s = s0 + s1 + s2 + bias
    qm = q_mask.astype(jnp.float32).reshape(B, 1, q_len)
    cm = c_mask.astype(jnp.float32).reshape(B, c_len, 1)
    s1m = jax.nn.softmax(qm * s + (1 - qm) * (-1e30), axis=2)
    s2m = jax.nn.softmax(cm * s + (1 - cm) * (-1e30), axis=1)
    a = jnp.matmul(s1m, q)
    b = jnp.matmul(jnp.matmul(s1m, jnp.swapaxes(s2m, 1, 2)), c)
    return jnp.concatenate([c, a, c * a, c * b], axis=2)


def _xavier_uniform(key, shape, fan_in, fan_out):
    bound = (6.0 / (fan_in + fan_out)) ** 0.5
    return jax.random.uniform(key, shape, jnp.float32, -bound, bound)


if __name__ == "__main__":
    B, c_len, q_len, H = 2, 16, 8, 32

    key = jax.random.PRNGKey(0)
    k_c, k_q, k_cw, k_qw, k_cqw = jax.random.split(key, 5)

    c = jax.random.normal(k_c, (B, c_len, H), jnp.float32)
    q = jax.random.normal(k_q, (B, q_len, H), jnp.float32)

    # Masks: valid prefixes of different lengths per batch element.
    c_lens = jnp.array([c_len, c_len - 4])
    q_lens = jnp.array([q_len, q_len - 2])
    c_mask = (jnp.arange(c_len)[None, :] < c_lens[:, None]).astype(jnp.float32)
    q_mask = (jnp.arange(q_len)[None, :] < q_lens[:, None]).astype(jnp.float32)

    # Parameters (deterministic xavier_uniform, matching torch fan rules).
    c_weight = _xavier_uniform(k_cw, (H, 1), H, 1)
    q_weight = _xavier_uniform(k_qw, (H, 1), H, 1)
    cq_weight = _xavier_uniform(k_cqw, (1, 1, H), H, H)
    # Nonzero bias: reference includes it; kernel drops it (exact cancellation).
    bias = jnp.full((1,), 0.25, jnp.float32)

    ref = _reference(c, q, c_mask, q_mask, c_weight, q_weight, cq_weight, bias)

    # f32 path.
    out = bidaf_attention(c, q, c_mask, q_mask,
                          c_weight, q_weight, cq_weight, bias)
    out = jax.block_until_ready(out)
    assert out.shape == (B, c_len, 4 * H), out.shape
    assert jnp.allclose(out, ref, atol=2e-2, rtol=2e-2), "f32 mismatch"

    # bf16 path: bf16 MXU inputs, f32 accumulation, bf16 output (halves the
    # dominant HBM writeback).
    c_bf, q_bf = c.astype(jnp.bfloat16), q.astype(jnp.bfloat16)
    out_bf = bidaf_attention(c_bf, q_bf, c_mask, q_mask,
                             c_weight, q_weight, cq_weight, bias)
    out_bf = jax.block_until_ready(out_bf)
    ref_bf = _reference(c_bf.astype(jnp.float32), q_bf.astype(jnp.float32),
                        c_mask, q_mask, c_weight, q_weight, cq_weight, bias)
    assert out_bf.shape == (B, c_len, 4 * H), out_bf.shape
    assert out_bf.dtype == jnp.bfloat16, out_bf.dtype
    assert jnp.allclose(out_bf.astype(jnp.float32), ref_bf,
                        atol=1e-1, rtol=1e-1), "bf16 mismatch"

    print("KERNEL_OK")
</pallas_src>

<mosaic_0001>
module attributes {stable_mosaic.version = 11 : i64} {
  func.func @_k_kernel(%arg0: i32, %arg1: i32, %arg2: memref<1x16x32xf32, #tpu.memory_space<vmem>>, %arg3: memref<1x8x32xf32, #tpu.memory_space<vmem>>, %arg4: memref<1x1x16xf32, #tpu.memory_space<vmem>>, %arg5: memref<1x8x32xf32, #tpu.memory_space<vmem>>, %arg6: memref<8x1xf32, #tpu.memory_space<vmem>>, %arg7: memref<8x1xf32, #tpu.memory_space<vmem>>, %arg8: memref<8x32xf32, #tpu.memory_space<vmem>>) attributes {dimension_semantics = [#tpu.dimension_semantics<parallel>, #tpu.dimension_semantics<arbitrary>], iteration_bounds = array<i64: 2, 1>, scalar_prefetch = 0 : i64, scratch_operands = 3 : i64, tpu.core_type = #tpu.core_type<tc>, window_params = [{transform_indices = @transform_0, window_bounds = array<i64: 1, 16, 32>}, {transform_indices = @transform_1, window_bounds = array<i64: 1, 8, 32>}, {transform_indices = @transform_2, window_bounds = array<i64: 1, 1, 16>}, {transform_indices = @transform_3, window_bounds = array<i64: 1, 8, 32>}]} {
    %c0_i32 = arith.constant 0 : i32
    %0 = arith.cmpi eq, %arg1, %c0_i32 : i32
    %1 = arith.extui %0 : i1 to i32
    %c0_i32_0 = arith.constant 0 : i32
    %2 = arith.cmpi ne, %1, %c0_i32_0 : i32
    scf.if %2 {
      %cst_28 = arith.constant 0xFF800000 : f32
      %41 = vector.broadcast %cst_28 : f32 to vector<8x1xf32>
      %c0_29 = arith.constant 0 : index
      %c0_30 = arith.constant 0 : index
      %42 = vector.load %arg6[%c0_29, %c0_30] : memref<8x1xf32, #tpu.memory_space<vmem>>, vector<8x1xf32>
      tpu.vector_store %arg6[%c0_29, %c0_30], %41 {strides = array<i32>} : memref<8x1xf32, #tpu.memory_space<vmem>>, vector<8x1xf32>,
      %cst_31 = arith.constant 0.000000e+00 : f32
      %43 = vector.broadcast %cst_31 : f32 to vector<8x1xf32>
      %c0_32 = arith.constant 0 : index
      %c0_33 = arith.constant 0 : index
      %44 = vector.load %arg7[%c0_32, %c0_33] : memref<8x1xf32, #tpu.memory_space<vmem>>, vector<8x1xf32>
      tpu.vector_store %arg7[%c0_32, %c0_33], %43 {strides = array<i32>} : memref<8x1xf32, #tpu.memory_space<vmem>>, vector<8x1xf32>,
      %cst_34 = arith.constant 0.000000e+00 : f32
      %45 = vector.broadcast %cst_34 : f32 to vector<8x32xf32>
      %c0_35 = arith.constant 0 : index
      %c0_36 = arith.constant 0 : index
      %46 = vector.load %arg8[%c0_35, %c0_36] : memref<8x32xf32, #tpu.memory_space<vmem>>, vector<8x32xf32>
      tpu.vector_store %arg8[%c0_35, %c0_36], %45 {strides = array<i32>} : memref<8x32xf32, #tpu.memory_space<vmem>>, vector<8x32xf32>,
    } else {
    }
    %c0 = arith.constant 0 : index
    %c0_1 = arith.constant 0 : index
    %c0_2 = arith.constant 0 : index
    %3 = vector.load %arg2[%c0, %c0_1, %c0_2] : memref<1x16x32xf32, #tpu.memory_space<vmem>>, vector<1x16x32xf32>
    %4 = vector.shape_cast %3 : vector<1x16x32xf32> to vector<16x32xf32>
    %c0_3 = arith.constant 0 : index
    %c0_4 = arith.constant 0 : index
    %c0_5 = arith.constant 0 : index
    %5 = vector.load %arg3[%c0_3, %c0_4, %c0_5] : memref<1x8x32xf32, #tpu.memory_space<vmem>>, vector<1x8x32xf32>
    %6 = vector.shape_cast %5 : vector<1x8x32xf32> to vector<8x32xf32>
    %c0_6 = arith.constant 0 : index
    %c0_7 = arith.constant 0 : index
    %c0_8 = arith.constant 0 : index
    %7 = vector.load %arg4[%c0_6, %c0_7, %c0_8] : memref<1x1x16xf32, #tpu.memory_space<vmem>>, vector<1x1x16xf32>
    %8 = vector.shape_cast %7 : vector<1x1x16xf32> to vector<1x16xf32>
    %cst = arith.constant dense<0.000000e+00> : vector<8x16xf32>
    %9 = tpu.matmul %6, %4, %cst {dimension_numbers = #tpu.dot_dimension_numbers<[1], [1], [0], [0], [0, 0, 1, 0], [], []>} : vector<8x32xf32>, vector<16x32xf32>, vector<8x16xf32> -> vector<8x16xf32>
    %cst_9 = arith.constant 0.000000e+00 : f32
    %10 = vector.broadcast %cst_9 : f32 to vector<1x16xf32>
    %11 = arith.cmpf ogt, %8, %10 : vector<1x16xf32>
    %cst_10 = arith.constant -1.000000e+30 : f32
    %12 = vector.shape_cast %11 : vector<1x16xi1> to vector<1x16xi1>
    %13 = vector.broadcast %12 : vector<1x16xi1> to vector<8x16xi1>
    %14 = vector.broadcast %cst_10 : f32 to vector<8x16xf32>
    %15 = arith.select %13, %9, %14 : vector<8x16xi1>, vector<8x16xf32>
    %c0_11 = arith.constant 0 : index
    %c0_12 = arith.constant 0 : index
    %16 = vector.load %arg6[%c0_11, %c0_12] : memref<8x1xf32, #tpu.memory_space<vmem>>, vector<8x1xf32>
    %cst_13 = arith.constant dense<0xFF800000> : vector<8xf32>
    %17 = vector.multi_reduction <maximumf>, %15, %cst_13 [1] : vector<8x16xf32> to vector<8xf32>
    %18 = vector.shape_cast %17 : vector<8xf32> to vector<8x1xf32>
    %19 = arith.maximumf %16, %18 : vector<8x1xf32>
    %20 = arith.subf %16, %19 : vector<8x1xf32>
    %21 = math.exp %20 : vector<8x1xf32>
    %22 = vector.broadcast %19 : vector<8x1xf32> to vector<8x16xf32>
    %23 = arith.subf %15, %22 : vector<8x16xf32>
    %24 = math.exp %23 : vector<8x16xf32>
    %c0_14 = arith.constant 0 : index
    %c0_15 = arith.constant 0 : index
    %25 = vector.load %arg7[%c0_14, %c0_15] : memref<8x1xf32, #tpu.memory_space<vmem>>, vector<8x1xf32>
    %26 = arith.mulf %21, %25 : vector<8x1xf32>
    %cst_16 = arith.constant dense<0.000000e+00> : vector<8xf32>
    %27 = vector.multi_reduction <add>, %24, %cst_16 [1] : vector<8x16xf32> to vector<8xf32>
    %28 = vector.shape_cast %27 : vector<8xf32> to vector<8x1xf32>
    %29 = arith.addf %26, %28 : vector<8x1xf32>
    %c0_17 = arith.constant 0 : index
    %c0_18 = arith.constant 0 : index
    %30 = vector.load %arg7[%c0_17, %c0_18] : memref<8x1xf32, #tpu.memory_space<vmem>>, vector<8x1xf32>
    tpu.vector_store %arg7[%c0_17, %c0_18], %29 {strides = array<i32>} : memref<8x1xf32, #tpu.memory_space<vmem>>, vector<8x1xf32>,
    %c0_19 = arith.constant 0 : index
    %c0_20 = arith.constant 0 : index
    %31 = vector.load %arg8[%c0_19, %c0_20] : memref<8x32xf32, #tpu.memory_space<vmem>>, vector<8x32xf32>
    %32 = vector.broadcast %21 : vector<8x1xf32> to vector<8x32xf32>
    %33 = arith.mulf %32, %31 : vector<8x32xf32>
    %cst_21 = arith.constant dense<0.000000e+00> : vector<8x32xf32>
    %34 = tpu.matmul %24, %4, %cst_21 {dimension_numbers = #tpu.dot_dimension_numbers<[1], [0], [0], [1], [0, 0, 1, 1], [], []>} : vector<8x16xf32>, vector<16x32xf32>, vector<8x32xf32> -> vector<8x32xf32>
    %35 = arith.addf %33, %34 : vector<8x32xf32>
    %c0_22 = arith.constant 0 : index
    %c0_23 = arith.constant 0 : index
    %36 = vector.load %arg8[%c0_22, %c0_23] : memref<8x32xf32, #tpu.memory_space<vmem>>, vector<8x32xf32>
    tpu.vector_store %arg8[%c0_22, %c0_23], %35 {strides = array<i32>} : memref<8x32xf32, #tpu.memory_space<vmem>>, vector<8x32xf32>,
    %c0_24 = arith.constant 0 : index
    %c0_25 = arith.constant 0 : index
    %37 = vector.load %arg6[%c0_24, %c0_25] : memref<8x1xf32, #tpu.memory_space<vmem>>, vector<8x1xf32>
    tpu.vector_store %arg6[%c0_24, %c0_25], %19 {strides = array<i32>} : memref<8x1xf32, #tpu.memory_space<vmem>>, vector<8x1xf32>,
    %c0_i32_26 = arith.constant 0 : i32
    %38 = arith.cmpi eq, %arg1, %c0_i32_26 : i32
    %39 = arith.extui %38 : i1 to i32
    %c0_i32_27 = arith.constant 0 : i32
    %40 = arith.cmpi ne, %39, %c0_i32_27 : i32
    scf.if %40 {
      %c0_28 = arith.constant 0 : index
      %c0_29 = arith.constant 0 : index
      %41 = vector.load %arg8[%c0_28, %c0_29] : memref<8x32xf32, #tpu.memory_space<vmem>>, vector<8x32xf32>
      %c0_30 = arith.constant 0 : index
      %c0_31 = arith.constant 0 : index
      %42 = vector.load %arg7[%c0_30, %c0_31] : memref<8x1xf32, #tpu.memory_space<vmem>>, vector<8x1xf32>
      %43 = vector.broadcast %42 : vector<8x1xf32> to vector<8x32xf32>
      %44 = arith.divf %41, %43 : vector<8x32xf32>
      %c0_32 = arith.constant 0 : index
      %c0_33 = arith.constant 0 : index
      %c0_34 = arith.constant 0 : index
      %45 = vector.load %arg5[%c0_32, %c0_33, %c0_34] : memref<1x8x32xf32, #tpu.memory_space<vmem>>, vector<1x8x32xf32>
      %46 = vector.shape_cast %45 : vector<1x8x32xf32> to vector<8x32xf32>
      %47 = vector.shape_cast %44 : vector<8x32xf32> to vector<1x8x32xf32>
      tpu.vector_store %arg5[%c0_32, %c0_33, %c0_34], %47 {strides = array<i32>} : memref<1x8x32xf32, #tpu.memory_space<vmem>>, vector<1x8x32xf32>,
    } else {
    }
    return
  }
  func.func @transform_0(%arg0: i32, %arg1: i32) -> (i32, i32, i32) {
    %c0_i32 = arith.constant 0 : i32
    %c0_i32_0 = arith.constant 0 : i32
    return %arg0, %arg1, %c0_i32 : i32, i32, i32
  }
  func.func @transform_1(%arg0: i32, %arg1: i32) -> (i32, i32, i32) {
    %c0_i32 = arith.constant 0 : i32
    %c0_i32_0 = arith.constant 0 : i32
    %c0_i32_1 = arith.constant 0 : i32
    return %arg0, %c0_i32, %c0_i32_0 : i32, i32, i32
  }
  func.func @transform_2(%arg0: i32, %arg1: i32) -> (i32, i32, i32) {
    %c0_i32 = arith.constant 0 : i32
    %c0_i32_0 = arith.constant 0 : i32
    return %arg0, %c0_i32, %arg1 : i32, i32, i32
  }
  func.func @transform_3(%arg0: i32, %arg1: i32) -> (i32, i32, i32) {
    %c0_i32 = arith.constant 0 : i32
    %c0_i32_0 = arith.constant 0 : i32
    %c0_i32_1 = arith.constant 0 : i32
    return %arg0, %c0_i32, %c0_i32_0 : i32, i32, i32
  }
}

module attributes {stable_mosaic.version = 11 : i64} {
  func.func @_out_kernel(%arg0: i32, %arg1: i32, %arg2: memref<1x16x32xf32, #tpu.memory_space<vmem>>, %arg3: memref<1x8x32xf32, #tpu.memory_space<vmem>>, %arg4: memref<1x8x64xf32, #tpu.memory_space<vmem>>, %arg5: memref<1x1x8xf32, #tpu.memory_space<vmem>>, %arg6: memref<1x16x128xf32, #tpu.memory_space<vmem>>) attributes {dimension_semantics = [#tpu.dimension_semantics<parallel>, #tpu.dimension_semantics<parallel>], iteration_bounds = array<i64: 2, 1>, scalar_prefetch = 0 : i64, scratch_operands = 0 : i64, tpu.core_type = #tpu.core_type<tc>, window_params = [{transform_indices = @transform_0, window_bounds = array<i64: 1, 16, 32>}, {transform_indices = @transform_1, window_bounds = array<i64: 1, 8, 32>}, {transform_indices = @transform_2, window_bounds = array<i64: 1, 8, 64>}, {transform_indices = @transform_3, window_bounds = array<i64: 1, 1, 8>}, {transform_indices = @transform_4, window_bounds = array<i64: 1, 16, 128>}]} {
    %c0 = arith.constant 0 : index
    %c0_0 = arith.constant 0 : index
    %c0_1 = arith.constant 0 : index
    %0 = vector.load %arg2[%c0, %c0_0, %c0_1] : memref<1x16x32xf32, #tpu.memory_space<vmem>>, vector<1x16x32xf32>
    %1 = vector.shape_cast %0 : vector<1x16x32xf32> to vector<16x32xf32>
    %c0_2 = arith.constant 0 : index
    %c0_3 = arith.constant 0 : index
    %c0_4 = arith.constant 0 : index
    %2 = vector.load %arg3[%c0_2, %c0_3, %c0_4] : memref<1x8x32xf32, #tpu.memory_space<vmem>>, vector<1x8x32xf32>
    %3 = vector.shape_cast %2 : vector<1x8x32xf32> to vector<8x32xf32>
    %c0_5 = arith.constant 0 : index
    %c0_6 = arith.constant 0 : index
    %c0_7 = arith.constant 0 : index
    %4 = vector.load %arg4[%c0_5, %c0_6, %c0_7] : memref<1x8x64xf32, #tpu.memory_space<vmem>>, vector<1x8x64xf32>
    %5 = vector.shape_cast %4 : vector<1x8x64xf32> to vector<8x64xf32>
    %c0_8 = arith.constant 0 : index
    %c0_9 = arith.constant 0 : index
    %c0_10 = arith.constant 0 : index
    %6 = vector.load %arg5[%c0_8, %c0_9, %c0_10] : memref<1x1x8xf32, #tpu.memory_space<vmem>>, vector<1x1x8xf32>
    %7 = vector.shape_cast %6 : vector<1x1x8xf32> to vector<1x8xf32>
    %cst = arith.constant dense<0.000000e+00> : vector<16x8xf32>
    %8 = tpu.matmul %1, %3, %cst {dimension_numbers = #tpu.dot_dimension_numbers<[1], [1], [0], [0], [0, 0, 1, 0], [], []>} : vector<16x32xf32>, vector<8x32xf32>, vector<16x8xf32> -> vector<16x8xf32>
    %9 = vector.broadcast %7 : vector<1x8xf32> to vector<16x8xf32>
    %10 = arith.addf %8, %9 : vector<16x8xf32>
    %cst_11 = arith.constant dense<0xFF800000> : vector<16xf32>
    %11 = vector.multi_reduction <maximumf>, %10, %cst_11 [1] : vector<16x8xf32> to vector<16xf32>
    %12 = vector.shape_cast %11 : vector<16xf32> to vector<16x1xf32>
    %13 = vector.broadcast %12 : vector<16x1xf32> to vector<16x8xf32>
    %14 = arith.subf %10, %13 : vector<16x8xf32>
    %15 = math.exp %14 : vector<16x8xf32>
    %cst_12 = arith.constant dense<0.000000e+00> : vector<16xf32>
    %16 = vector.multi_reduction <add>, %15, %cst_12 [1] : vector<16x8xf32> to vector<16xf32>
    %17 = vector.shape_cast %16 : vector<16xf32> to vector<16x1xf32>
    %18 = tpu.reciprocal %17 {approx = true} : vector<16x1xf32> -> vector<16x1xf32>
    %19 = vector.broadcast %18 : vector<16x1xf32> to vector<16x8xf32>
    %20 = arith.mulf %15, %19 : vector<16x8xf32>
    %cst_13 = arith.constant dense<0.000000e+00> : vector<16x64xf32>
    %21 = tpu.matmul %20, %5, %cst_13 {dimension_numbers = #tpu.dot_dimension_numbers<[1], [0], [0], [1], [0, 0, 1, 1], [], []>} : vector<16x8xf32>, vector<8x64xf32>, vector<16x64xf32> -> vector<16x64xf32>
    %22 = vector.extract_strided_slice %21 {offsets = [0, 0], sizes = [16, 32], strides = [1, 1]} : vector<16x64xf32> to vector<16x32xf32>
    %23 = vector.extract_strided_slice %21 {offsets = [0, 32], sizes = [16, 32], strides = [1, 1]} : vector<16x64xf32> to vector<16x32xf32>
    %c0_14 = arith.constant 0 : index
    %c0_15 = arith.constant 0 : index
    %c0_16 = arith.constant 0 : index
    %24 = vector.load %arg6[%c0_14, %c0_15, %c0_16] : memref<1x16x128xf32, #tpu.memory_space<vmem>>, vector<1x16x32xf32>
    %25 = vector.shape_cast %24 : vector<1x16x32xf32> to vector<16x32xf32>
    %26 = vector.shape_cast %1 : vector<16x32xf32> to vector<1x16x32xf32>
    tpu.vector_store %arg6[%c0_14, %c0_15, %c0_16], %26 {strides = array<i32>} : memref<1x16x128xf32, #tpu.memory_space<vmem>>, vector<1x16x32xf32>,
    %c0_17 = arith.constant 0 : index
    %c0_18 = arith.constant 0 : index
    %c32 = arith.constant 32 : index
    %27 = vector.load %arg6[%c0_17, %c0_18, %c32] : memref<1x16x128xf32, #tpu.memory_space<vmem>>, vector<1x16x32xf32>
    %28 = vector.shape_cast %27 : vector<1x16x32xf32> to vector<16x32xf32>
    %29 = vector.shape_cast %22 : vector<16x32xf32> to vector<1x16x32xf32>
    tpu.vector_store %arg6[%c0_17, %c0_18, %c32], %29 {strides = array<i32>} : memref<1x16x128xf32, #tpu.memory_space<vmem>>, vector<1x16x32xf32>,
    %30 = arith.mulf %1, %22 : vector<16x32xf32>
    %c0_19 = arith.constant 0 : index
    %c0_20 = arith.constant 0 : index
    %c64 = arith.constant 64 : index
    %31 = vector.load %arg6[%c0_19, %c0_20, %c64] : memref<1x16x128xf32, #tpu.memory_space<vmem>>, vector<1x16x32xf32>
    %32 = vector.shape_cast %31 : vector<1x16x32xf32> to vector<16x32xf32>
    %33 = vector.shape_cast %30 : vector<16x32xf32> to vector<1x16x32xf32>
    tpu.vector_store %arg6[%c0_19, %c0_20, %c64], %33 {strides = array<i32>} : memref<1x16x128xf32, #tpu.memory_space<vmem>>, vector<1x16x32xf32>,
    %34 = arith.mulf %1, %23 : vector<16x32xf32>
    %c0_21 = arith.constant 0 : index
    %c0_22 = arith.constant 0 : index
    %c96 = arith.constant 96 : index
    %35 = vector.load %arg6[%c0_21, %c0_22, %c96] : memref<1x16x128xf32, #tpu.memory_space<vmem>>, vector<1x16x32xf32>
    %36 = vector.shape_cast %35 : vector<1x16x32xf32> to vector<16x32xf32>
    %37 = vector.shape_cast %34 : vector<16x32xf32> to vector<1x16x32xf32>
    tpu.vector_store %arg6[%c0_21, %c0_22, %c96], %37 {strides = array<i32>} : memref<1x16x128xf32, #tpu.memory_space<vmem>>, vector<1x16x32xf32>,
    return
  }
  func.func @transform_0(%arg0: i32, %arg1: i32) -> (i32, i32, i32) {
    %c0_i32 = arith.constant 0 : i32
    %c0_i32_0 = arith.constant 0 : i32
    return %arg0, %arg1, %c0_i32 : i32, i32, i32
  }
  func.func @transform_1(%arg0: i32, %arg1: i32) -> (i32, i32, i32) {
    %c0_i32 = arith.constant 0 : i32
    %c0_i32_0 = arith.constant 0 : i32
    %c0_i32_1 = arith.constant 0 : i32
    return %arg0, %c0_i32, %c0_i32_0 : i32, i32, i32
  }
  func.func @transform_2(%arg0: i32, %arg1: i32) -> (i32, i32, i32) {
    %c0_i32 = arith.constant 0 : i32
    %c0_i32_0 = arith.constant 0 : i32
    %c0_i32_1 = arith.constant 0 : i32
    return %arg0, %c0_i32, %c0_i32_0 : i32, i32, i32
  }
  func.func @transform_3(%arg0: i32, %arg1: i32) -> (i32, i32, i32) {
    %c0_i32 = arith.constant 0 : i32
    %c0_i32_0 = arith.constant 0 : i32
    %c0_i32_1 = arith.constant 0 : i32
    return %arg0, %c0_i32, %c0_i32_0 : i32, i32, i32
  }
  func.func @transform_4(%arg0: i32, %arg1: i32) -> (i32, i32, i32) {
    %c0_i32 = arith.constant 0 : i32
    %c0_i32_0 = arith.constant 0 : i32
    return %arg0, %arg1, %c0_i32 : i32, i32, i32
  }
}

</mosaic_0001>

<bundles_post_ra>
// kernel: bidaf_attention.3
= control target key start
LH: loop header
LB: loop body
LE: loop exit
PB: predicated region body
PF: predicated region fallthrough
CT: control target
= control target key end

     0   :  { %9 = vsyncpa [#allocation3], 0  ;;  %s894_s0 = inlined_call_operand.vmem [shape: f32[2,16,32], index: 0, kind: input, shape index: {}]   ;;  %s895_s1 = inlined_call_operand.vmem [shape: f32[2,8,32], index: 1, kind: input, shape index: {}]   ;;  %s896_s2 = inlined_call_operand.vmem [shape: f32[2,8,64], index: 2, kind: input, shape index: {}]   ;;  %s897_s3 = inlined_call_operand.vmem [shape: f32[2,1,8], index: 3, kind: input, shape index: {}]   ;;  %s898_s4 = inlined_call_operand.hbm [shape: f32[2,16,128], index: 4, kind: output, shape index: {}]  }
   0x1   :  { %11 = vsyncpa [#allocation3 + $0x1], 0  ;;  %s746_s15 = smov 0   ;;  %s748_s16 = smov 0  }
   0x2   :  { %s750_s17 = smov 0   ;;  %s752_s18 = smov 0  }
   0x3   :  { %s754_s19 = smov 0   ;;  %s756_s20 = smov 0  }
   0x4 LB: > { %s543_s21 = sadd.s32 4294967295, %s714_s20   ;;  %s544_s22 = sadd.s32 4294967294, %s714_s20   ;;  %s714_s20 = sphi %s756_s20, %s17_s20   ;;  %s710_s19 = sphi %s754_s19, %s905_s19   ;;  %s706_s18 = sphi %s752_s18, %s904_s18   ;;  %s702_s17 = sphi %s750_s17, %s903_s17   ;;  %s698_s16 = sphi %s748_s16, %s902_s16   ;;  %s694_s15 = sphi %s746_s15, %s901_s15  }
   0x5   : > { %s29_s23 = sadd.s32 1, %s710_s19  ;;  %s144_s24 = sadd.s32 1, %s702_s17 }
   0x6   : > { %p31_p0 = scmp.ge.s32.totalorder %s29_s23, 2  ;;  %p154_p1 = scmp.ne.s32.totalorder %s702_s17, %s698_s16 }
   0x7   : > { %p155_p2 = scmp.eq.s32.totalorder %s543_s21, 1  ;;  %p160_p3 = scmp.ne.s32.totalorder %s698_s16, %s694_s15 }
   0x8   : > { %s907_s23 = smov (%p31_p0, %s29_s23), 0  ;;  %p161_p5 = scmp.eq.s32.totalorder %s544_s22, 1 }
   0x9   : > { %p786_p4 = por %p155_p2, %p154_p1  ;;  %s139_s26 = ssub.s32 %s710_s19, %s907_s23 }
   0xa   : > { %p547_p6 = scmp.ge.s32.totalorder %s714_s20, 1  ;;  %p142_p7 = scmp.eq.s32.totalorder %s139_s26, 0 }
   0xb   : > { %p793_p8 = por %p161_p5, %p160_p3  ;;  %p212_p9 = scmp.lt.s32.totalorder %s714_s20, 3 }
   0xc   : > { %s799_s28 = scalar_select %p142_p7, %s702_s17, %s144_s24  }
   0xd   : > { %p213_p10 = pnand %p547_p6, %p212_p9 }
   0xe   : > { %p254_p11 = scmp.lt.s32.totalorder (!%p213_p10), %s706_s18, 1  ;;  %s250_s26 = sand.u32 (!%p213_p10), 1, %s698_s16  }
   0xf   : > { %216 = sbr.rel (%p213_p10) target bundleno = 770 (0x302), region = 36  ;;  %s717_s6 = smov (!%p213_p10), 96  }
  0x10   : > { %s718_s7 = smov (!%p213_p10), 64  }
  0x14   : > { %s803_s29 = scalar_select %p254_p11, %s706_s18, 1  ;;  %vm283_vm0 = vcmask 261120   ;;  %vm316_vm1 = vcmask 64512   ;;  %vm378_vm2 = vcmask 523520   ;;  %vm391_vm3 = vcmask 785920  }
  0x15   : > { %vm410_vm4 = vcmask 1048320  }
  0x16   : > { %s551_s30 = sshll.u32 %s803_s29, 3  ;;  %s563_s5 = sshll.u32 %s803_s29, 4 }
  0x17   : > { %s266_s8 = scalar_lea.vmem %s895_s1, %s551_s30  ;;  %s261_s11 = scalar_lea.vmem %s894_s0, %s563_s5 }
  0x18   : > { %v277_v0 = vld [vmem:[%s266_s8] sm:$0xff]  ;;  %s273_s14 = scalar_lea.vmem %s897_s3, %s803_s29  ;;  %v820_v1 = vld [vmem:[%s261_s11 + $0x8] sm:$0xff]  ;;  %s270_s24 = scalar_lea.vmem %s896_s2, %s551_s30 }
  0x19   : > { %565 = vmatpush.xpose.msk.msra.mxu2 %vm283_vm0, %v277_v0  ;;  %553 = vmatpush.xpose.msk.msra.mxu0 %vm283_vm0, %v277_v0  ;;  %v275_v2 = vld [vmem:[%s261_s11] sm:$0xff]  ;;  %s548_s29 = sshll.u32 %s250_s26, 4  ;;  %s716_s30 = smov 32  }
  0x1a   : > { %v627_v3 = vld [vmem:[%s273_s14] ss:$0 sm:$0xff]  ;;  %s840_s5 = scalar_lea.vmem [#allocation2], %s548_s29  ;;  %s564_s8 = sshll.u32 %s706_s18, 4 }
  0x1b   : > { %v278_v20 = vld [vmem:[%s270_s24] sm:$0xff]  ;;  %369 = vst.msk [vmem:[%s840_s5 + $0x8] sm:$0xff] %vm283_vm0, %v820_v1  ;;  %s427_s11 = scalar_lea.hbm %s898_s4, %s564_s8  ;;  %s428_s12 = sshll.u32 %s840_s5, 4  ;;  %s429_s12 = int_to_ptr.vmem [resolvable:$true] %s428_s12 }
  0x1c   : > { %555 = vmatmul.msk.f32.vlgmr.msra.gmra.mxu2 %vm283_vm0, %v820_v1  ;;  %554 = vmatmul.msk.f32.vlgmr.msra.gmra.mxu0 %vm283_vm0, %v275_v2  ;;  %368 = vst.msk [vmem:[%s840_s5] sm:$0xff] %vm283_vm0, %v275_v2  ;;  %s430_s13 = sshll.u32 %s427_s11, 4  ;;  %s414_s14 = scalar_lea.sflag [#allocation3], %s250_s26  ;;  %s431_s13 = int_to_ptr.hbm [resolvable:$true] %s430_s13 }
  0x1d   : > { %566 = vmatpush.msra.mxu3 %v278_v20  ;;  %360 = vmatpush.msra.mxu1 %v278_v20  ;;  %s650_s21 = sshra.s32 %s431_s13, 4  ;;  %s656_s29 = scalar_lea.hbm %s898_s4, 32  ;;  %s651_s21 = int_to_ptr.hbm [resolvable:$true] %s650_s21 }
  0x1e   : > { %s652_s22 = scalar_lea.hbm %s651_s21, 16  ;;  %p657_p1 = scmp.lt.s32.totalorder %s651_s21, %s898_s4 }
  0x1f   : > { %p653_p12 = scmp.ne.s32.totalorder %s651_s21, %s652_s22  ;;  %p658_p2 = scmp.lt.s32.totalorder %s656_s29, %s652_s22 }
  0x21   : > { %p654_p13 = pnand %p653_p12, %p786_p4  ;;  %p659_p3 = por %p658_p2, %p657_p1 }
  0x23   : > { %p655_p0 = pneg %p654_p13 }
  0x25   : > { %p660_p5 = pnand %p659_p3, %p655_p0 }
  0x99   : > { %v310_v6 = vpop.f32.mrf.mxu0 }
  0x9a   : > { %v311_v8 = vadd.f32 %v627_v3, %v310_v6 }
  0x9c   : > { %v317_v9 = vsel %vm316_vm1, %v311_v8, -inf }
  0x9f   : > { %v313_v4 = vpop.f32.mrf.mxu2 }
  0xa0   : > { %v314_v5 = vadd.f32 %v627_v3, %v313_v4 }
  0xa2   : > { %v320_v7 = vsel %vm316_vm1, %v314_v5, -inf }
  0xa3   : > { %321 = vmax.xlane.f32.xlu0 %v320_v7 }
  0xab   : > { %318 = vmax.xlane.f32.xlu0 %v317_v9 }
 0x116   : > { %v322_v10 = vpop.xlane.xlu0 %321 }
 0x117   : > { %v324_v11 = vsub.f32 %v314_v5, %v322_v10 }
 0x119   : > { %v327_v12 = vmul.f32 1.442695, %v324_v11 }
 0x11b   : > { %628 = vpow2.f32 %v327_v12 }
 0x11e   : > { %v319_v13 = vpop.xlane.xlu0 %318 }
 0x11f   : > { %v323_v14 = vsub.f32 %v311_v8, %v319_v13 }
 0x121   : > { %v629_v15 = vpop.eup %628  ;;  %v325_v16 = vmul.f32 1.442695, %v323_v14 }
 0x122   : > { %v332_v17 = vsel %vm316_vm1, %v629_v15, 0.0 }
 0x123   : > { %630 = vpow2.f32 %v325_v16  ;;  %333 = vadd.xlane.f32.xlu1 %v332_v17 }
 0x129   : > { %v631_v18 = vpop.eup %630 }
 0x12a   : > { %v329_v19 = vsel %vm316_vm1, %v631_v18, 0.0 }
 0x12b   : > { %330 = vadd.xlane.f32.xlu1 %v329_v19 }
 0x196   : > { %v334_v21 = vpop.xlane.xlu1 %333 }
 0x197   : > { %632 = vrcp.f32 %v334_v21 }
 0x19d   : > { %v633_v22 = vpop.eup %632 }
 0x19e   : > { %v331_v23 = vpop.xlane.xlu1 %330  ;;  %v338_v24 = vmul.f32 %v633_v22, %v629_v15 }
 0x19f   : > { %634 = vrcp.f32 %v331_v23 }
 0x1a0   : > { %557 = vmatmul.msk.f32.vlgmr.msra.gmra.mxu3 %vm316_vm1, %v338_v24 }
 0x1a5   : > { %v635_v25 = vpop.eup %634 }
 0x1a6   : > { %v337_v26 = vmul.f32 %v635_v25, %v631_v18 }
 0x1a8   : > { %556 = vmatmul.msk.f32.vlgmr.msra.gmra.mxu1 %vm316_vm1, %v337_v26 }
 0x223   : > { %v365_v27 = vpop.f32.mrf.mxu3 }
 0x224   : > { %374 = vrot.lane.b32.xlu1 %v365_v27, %s716_s30  ;;  %v382_v30 = vmul.f32 %v365_v27, %v820_v1 }
 0x225   : > { %v362_v28 = vpop.f32.mrf.mxu1 }
 0x226   : > { %372 = vrot.lane.b32.xlu0 %v362_v28, %s716_s30  ;;  %394 = vrot.lane.b32.xlu2 %v362_v28, %s717_s6  ;;  %v381_v29 = vmul.f32 %v362_v28, %v275_v2 }
 0x22e   : > { %396 = vrot.lane.b32.xlu2 %v365_v27, %s717_s6 }
 0x236   : > { %385 = vrot.lane.b32.xlu2 %v381_v29, %s718_s7 }
 0x23e   : > { %387 = vrot.lane.b32.xlu2 %v382_v30, %s718_s7 }
 0x280   : > { %v395_v31 = vpop.permute.xlu2 %394 }
 0x281   : > { %v400_v32 = vmul.f32 %v395_v31, %v275_v2 }
 0x283   : > { %404 = vrot.lane.b32.xlu2 %v400_v32, %s717_s6 }
 0x288   : > { %v397_v33 = vpop.permute.xlu2 %396 }
 0x289   : > { %v401_v34 = vmul.f32 %v397_v33, %v820_v1 }
 0x28b   : > { %406 = vrot.lane.b32.xlu0 %v401_v34, %s717_s6 }
 0x290   : > { %v386_v35 = vpop.permute.xlu2 %385 }
 0x296   : > { %v375_v36 = vpop.permute.xlu1 %374 }
 0x297   : > { %380 = vst.msk [vmem:[%s840_s5 + $0x8] sm:$0xff] %vm378_vm2, %v375_v36 }
 0x298   : > { %v373_v37 = vpop.permute.xlu0 %372  ;;  %v388_v38 = vpop.permute.xlu2 %387 }
 0x299   : > { %379 = vst.msk [vmem:[%s840_s5] sm:$0xff] %vm378_vm2, %v373_v37 }
 0x29a   : > { %393 = vst.msk [vmem:[%s840_s5 + $0x8] sm:$0xff] %vm391_vm3, %v388_v38 }
 0x29b   : > { %392 = vst.msk [vmem:[%s840_s5] sm:$0xff] %vm391_vm3, %v386_v35 }
 0x2dd   : > { %v405_v39 = vpop.permute.xlu2 %404 }
 0x2de   : > { %411 = vst.msk [vmem:[%s840_s5] sm:$0xff] %vm410_vm4, %v405_v39 }
 0x2fd   : > { %v407_v40 = vpop.permute.xlu0 %406 }
 0x2fe   : > { %412 = vst.msk [vmem:[%s840_s5 + $0x8] sm:$0xff] %vm410_vm4, %v407_v40 }
 0x2ff   : > { %663 = shalt.err (!%p660_p5)
}
 0x300   : > { %s719_s26 = smov 128   ;;  %s720_s5 = smov 8  }
 0x301   : > { %567 = dma.vmem_to_hbm [thread:$0]  (%p786_p4), %s429_s12, 256, %s431_s13, %s414_s14, %s719_s26, %s719_s26, %s720_s5  }
 0x302 PF: > { %p573_p6 = scmp.ge.s32.totalorder %s714_s20, 2  ;;  %s445_s7 = sand.u32 1, %s694_s15  }
 0x303   : > { %s446_s8 = scalar_lea.sflag [#allocation3], %s445_s7 }
 0x304   : > { %p570_p7 = pnand %p573_p6, %p793_p8 }
 0x306   : > { %p571_p9 = pneg %p570_p7 }
 0x308   : > { %689 = dma.done.wait (%p571_p9), %s446_s8, 256  }
 0x309   : > { %691 = vsyncadd (%p571_p9), %s446_s8, 4294967040  ;;  %s17_s20 = sadd.s32 1, %s714_s20   ;;  %s901_s15 = smov %s698_s16 }
 0x30a   : > { %p14_p10 = scmp.ge.s32.totalorder %s17_s20, 4   ;;  %s902_s16 = smov %s702_s17 }
 0x30b   : > { %s903_s17 = smov %s799_s28  ;;  %s904_s18 = smov %s710_s19 }
 0x30c   : > { %s905_s19 = smov %s907_s23  ;;  %16 = sbr.rel (!%p14_p10) target bundleno = 4 (0x4), region = 80 }
 0x311   :  { %452 = vsyncpa [#allocation3], 1 }
 0x312   :  { %454 = vsyncpa [#allocation3 + $0x1], 1 }

// kernel: bidaf_attention.2
= control target key start
LH: loop header
LB: loop body
LE: loop exit
PB: predicated region body
PF: predicated region fallthrough
CT: control target
= control target key end

     0   :  { %s561_s12 = smov 0   ;;  %s563_s13 = smov 0   ;;  %s622_s0 = inlined_call_operand.vmem [shape: f32[2,16,32], index: 0, kind: input, shape index: {}]   ;;  %s623_s1 = inlined_call_operand.vmem [shape: f32[2,8,32], index: 1, kind: input, shape index: {}]   ;;  %s624_s2 = inlined_call_operand.vmem [shape: f32[2,1,16], index: 2, kind: input, shape index: {}]   ;;  %s625_s3 = inlined_call_operand.vmem [shape: f32[2,8,32], index: 3, kind: output, shape index: {}]  }
   0x1   :  { %s565_s14 = smov 0  }
   0x2 LB: > { %s25_s15 = sadd.s32 1, %s532_s13  ;;  %p466_p0 = scmp.ge.s32.totalorder %s536_s14, 1  ;;  %s536_s14 = sphi %s565_s14, %s13_s14   ;;  %s532_s13 = sphi %s563_s13, %s627_s13   ;;  %s528_s12 = sphi %s561_s12, %s626_s12  }
   0x3   : > { %p27_p1 = scmp.ge.s32.totalorder %s25_s15, 2  ;;  %p178_p2 = scmp.lt.s32.totalorder %s536_s14, 3 }
   0x5   : > { %s629_s15 = smov (%p27_p1, %s25_s15), 0  ;;  %p179_p3 = pnand %p466_p0, %p178_p2 }
   0x6   : > { %p216_p4 = scmp.lt.s32.totalorder (!%p179_p3), %s528_s12, 1 }
   0x7   : > { %182 = sbr.rel (%p179_p3) target bundleno = 657 (0x291), region = 32 }
   0xc   : > { %vm246_vm0 = vcmask 261120   ;;  %v538_v0 = vmov 0.0   ;;  %s631_s12 = smov (!%p216_p4, %s528_s12), 1  ;;  %v539_v4 = vmov 0   ;;  %vm243_vm1 = vcmask 7168  }
   0xd   : > { %247 = vst.msk [vmem:[#allocation4] sm:$0xff] %vm246_vm0, %v538_v0  ;;  %s477_s16 = sshll.u32 %s631_s12, 4  ;;  %s469_s20 = sshll.u32 %s631_s12, 3  ;;  %505 = vset.pattern.permute.xlu0 %v539_v4  ;;  %507 = vset.pattern.permute.xlu2 %v539_v4  ;;  %v540_v5 = vmov -inf   ;;  %vm288_vm4 = vcmask 130048  }
   0xe   : > { %s223_s19 = scalar_lea.vmem %s622_s0, %s477_s16  ;;  %s228_s23 = scalar_lea.vmem %s623_s1, %s469_s20  ;;  %506 = vset.pattern.permute.xlu1 %v539_v4  ;;  %244 = vst.msk [vmem:[#allocation2] sm:$0xff] %vm243_vm1, %v540_v5 }
   0xf   : > { %v249_v1 = vld [vmem:[%s223_s19 + $0x8] sm:$0xff]  ;;  %v248_v2 = vld [vmem:[%s223_s19] sm:$0xff]  ;;  %245 = vst.msk [vmem:[#allocation3] sm:$0xff] %vm243_vm1, %v538_v0  ;;  %s234_s26 = scalar_lea.vmem %s624_s2, %s631_s12  ;;  %s238_s29 = scalar_lea.vmem %s625_s3, %s469_s20 }
  0x10   : > { %471 = vmatpush.xpose.msk.msra.mxu0 %vm246_vm0, %v249_v1  ;;  %336 = vmatpush.msra.mxu1 %v249_v1  ;;  %v250_v3 = vld [vmem:[%s228_s23] sm:$0xff] }
  0x11   : > { %v251_v6 = vld [vmem:[%s234_s26] sm:$0x1] }
  0x12   : > { %337 = vmatpush.msra.mxu1 %v248_v2  ;;  %vm282_vm2 = vcmp.gt.f32.partialorder %v251_v6, 0.0 }
  0x13   : > { %v283_v7 = vsel %vm282_vm2, 1, %v539_v4 }
  0x14   : > { %472 = vmatpush.xpose.msk.msra.mxu0 %vm246_vm0, %v248_v2  ;;  %v284_v8 = vperm.slane %v283_v7, 0  ;;  %v312_v27 = vld [vmem:[#allocation4] sm:$0xff] }
  0x15   : > { %v287_v12 = vld [vmem:[#allocation2] sm:$0xff] }
  0x16   : > { %vm285_vm3 = vcmp.eq.s32.totalorder %v284_v8, 1  ;;  %v304_v23 = vld [vmem:[#allocation3] sm:$0xff] }
  0x17   : > { %473 = vmatmul.msk.f32.vlgmr.msra.gmra.mxu0 %vm246_vm0, %v250_v3 }
  0x94   : > { %v279_v9 = vpop.f32.mrf.mxu0 }
  0x95   : > { %v286_v10 = vsel %vm285_vm3, %v279_v9, -1e+30 }
  0x96   : > { %v289_v11 = vsel %vm288_vm4, %v286_v10, -inf }
  0x97   : > { %290 = vmax.xlane.f32.xlu0 %v289_v11 }
 0x10a   : > { %v291_v13 = vpop.xlane.xlu0 %290 }
 0x10b   : > { %v292_v14 = vmax.f32 %v287_v12, %v291_v13 }
 0x10d   : > { %v293_v15 = vsub.f32 %v287_v12, %v292_v14  ;;  %344 = vst.msk [vmem:[#allocation2] sm:$0xff] %vm243_vm1, %v292_v14  ;;  %298 = vperm.xlu0 %505, %v292_v14  }
 0x10f   : > { %v294_v16 = vmul.f32 1.442695, %v293_v15 }
 0x111   : > { %508 = vpow2.f32 %v294_v16 }
 0x117   : > { %v509_v17 = vpop.eup %508 }
 0x118   : > { %315 = vperm.xlu2 %507, %v509_v17   ;;  %v305_v24 = vmul.f32 %v509_v17, %v304_v23 }
 0x172   : > { %v316_v28 = vpop.permute.xlu2 %315 }
 0x173   : > { %v318_v29 = vmul.f32 %v316_v28, %v312_v27 }
 0x17f   : > { %v299_v18 = vpop.permute.xlu0 %298 }
 0x180   : > { %v301_v19 = vsub.f32 %v286_v10, %v299_v18 }
 0x182   : > { %v302_v20 = vmul.f32 1.442695, %v301_v19 }
 0x184   : > { %510 = vpow2.f32 %v302_v20 }
 0x18a   : > { %v511_v21 = vpop.eup %510 }
 0x18b   : > { %474 = vmatmul.msk.f32.vlgmr.msra.gmra.mxu1 %vm288_vm4, %v511_v21  ;;  %v306_v22 = vsel %vm288_vm4, %v511_v21, 0.0 }
 0x18c   : > { %307 = vadd.xlane.f32.xlu1 %v306_v22 }
 0x1ff   : > { %v308_v25 = vpop.xlane.xlu1 %307 }
 0x200   : > { %v309_v26 = vadd.f32 %v308_v25, %v305_v24 }
 0x202   : > { %311 = vst.msk [vmem:[#allocation3] sm:$0xff] %vm243_vm1, %v309_v26 }
 0x208   : > { %v339_v30 = vpop.f32.mrf.mxu1 }
 0x209   : > { %v342_v31 = vadd.f32 %v339_v30, %v318_v29  ;;  %v349_v32 = vld [vmem:[#allocation3] sm:$0xff] }
 0x20a   : > { %352 = vperm.xlu1 %506, %v349_v32  }
 0x20b   : > { %343 = vst.msk [vmem:[#allocation4] sm:$0xff] %vm246_vm0, %v342_v31 }
 0x212   : > { %v348_v43 = vld [vmem:[#allocation4] sm:$0xff] }
 0x27c   : > { %v353_v33 = vpop.permute.xlu1 %352 }
 0x27d   : > { %512 = vrcp.f32 %v353_v33  ;;  %v366_v37 = vand.u32 2147483648, %v353_v33  ;;  %v364_v39 = vand.u32 2147483647, %v353_v33  ;;  %vm360_vm6 = vweird.f32 %v353_v33 }
 0x27f   : > { %v367_v41 = vor.u32 1.1754944e-38, %v366_v37  ;;  %vm365_vm8 = vcmp.eq.f32.partialorder %v364_v39, 8.507059e+37 }
 0x283   : > { %v513_v34 = vpop.eup %512 }
 0x284   : > { %v356_v35 = vmul.f32 %v513_v34, %v353_v33  ;;  %vm361_vm5 = vweird.f32 %v513_v34 }
 0x285   : > { %vm362_vm7 = vmor %vm360_vm6, %vm361_vm5 }
 0x286   : > { %v357_v36 = vsub.f32 1.0, %v356_v35 }
 0x288   : > { %v358_v38 = vmul.f32 %v513_v34, %v357_v36 }
 0x28a   : > { %v359_v40 = vadd.f32 %v513_v34, %v358_v38 }
 0x28c   : > { %v363_v42 = vsel %vm362_vm7, %v513_v34, %v359_v40 }
 0x28d   : > { %v368_v44 = vsel %vm365_vm8, %v367_v41, %v363_v42 }
 0x28e   : > { %v369_v45 = vmul.f32 %v368_v44, %v348_v43 }
 0x290   : > { %370 = vst.msk [vmem:[%s238_s29] sm:$0xff] %vm246_vm0, %v369_v45 }
 0x291 PF: > { %s13_s14 = sadd.s32 1, %s536_s14   ;;  %s626_s12 = smov %s532_s13 }
 0x292   : > { %p10_p5 = scmp.ge.s32.totalorder %s13_s14, 4   ;;  %s627_s13 = smov %s629_s15 }
 0x294   :  { %12 = sbr.rel (!%p10_p5) target bundleno = 2 (0x2), region = 76 }

</bundles_post_ra>
